<compile_context>
chip_gen: v5e
topology: v5e:2x2
jax: 0.10.0
libtpu: 0.0.40
codegen_flags: <defaults>
</compile_context>

<pallas_src>
import functools

import jax
import jax.numpy as jnp
from jax.experimental import pallas as pl
from jax.experimental.pallas import tpu as pltpu


def actor_kernel(x_ref, w1_ref, b1_ref, w2_ref, b2_ref, w3_ref, b3_ref, o_ref):
    # x_ref: [S, TB] bf16; w*: [out, in] bf16; b*: [out, 1] f32; o: [A, TB] f32.
    x = x_ref[...]
    # fc1 + ReLU  -> [F1, TB] f32
    h1 = jnp.maximum(
        jnp.dot(w1_ref[...], x, preferred_element_type=jnp.float32) + b1_ref[...],
        0.0,
    )
    # fc2 + ReLU  -> [F2, TB] f32
    h2 = jnp.maximum(
        jnp.dot(w2_ref[...], h1.astype(jnp.bfloat16),
                preferred_element_type=jnp.float32) + b2_ref[...],
        0.0,
    )
    # fc3 + tanh  -> [A, TB] f32 (lane-dense store)
    h3 = (jnp.dot(w3_ref[...], h2.astype(jnp.bfloat16),
                  preferred_element_type=jnp.float32) + b3_ref[...])
    o_ref[...] = jnp.tanh(h3).astype(o_ref.dtype)


def _round_up(x, m):
    return ((x + m - 1) // m) * m


@functools.partial(jax.jit, static_argnames=("batch_tile",))
def actor_forward(x, w1, b1, w2, b2, w3, b3, *, batch_tile=8192):
    """x: [B, S] f32.  w*: [out, in] f32/bf16.  b*: [out, 1] f32.  Returns [B, A] f32."""
    B, S = x.shape
    F1 = w1.shape[0]
    F2 = w2.shape[0]
    A = w3.shape[0]

    # Batch (lane) tile selection:
    #   * small batch -> single block covering the whole batch (block == full dim).
    #   * otherwise   -> multiple of 128, capped so the grid has >= 2 steps
    #     (feeds both v7x TensorCores) and at most `batch_tile` columns.
    if B <= 256:
        tb = B
    else:
        tb = min(_round_up(batch_tile, 128), _round_up(pl.cdiv(B, 2), 128))
    grid = (pl.cdiv(B, tb),)

    # Feature-major layout + bf16 MXU operands (cast is a tiny one-off XLA op).
    x_t = jnp.transpose(x).astype(jnp.bfloat16)        # [S, B]
    w1b = w1.astype(jnp.bfloat16)
    w2b = w2.astype(jnp.bfloat16)
    w3b = w3.astype(jnp.bfloat16)
    b1f = b1.astype(jnp.float32)
    b2f = b2.astype(jnp.float32)
    b3f = b3.astype(jnp.float32)

    # Weights / biases: same (only) block for every grid step -> resident in
    # VMEM, DMA'd from HBM exactly once.
    resident = lambda shape: pl.BlockSpec(shape, lambda i: (0, 0))

    out_t = pl.pallas_call(
        actor_kernel,
        out_shape=jax.ShapeDtypeStruct((A, B), jnp.float32),
        grid=grid,
        in_specs=[
            pl.BlockSpec((S, tb), lambda i: (0, i)),    # x: streamed over batch lanes
            resident((F1, S)), resident((F1, 1)),       # fc1
            resident((F2, F1)), resident((F2, 1)),      # fc2
            resident((A, F2)), resident((A, 1)),        # fc3
        ],
        out_specs=pl.BlockSpec((A, tb), lambda i: (0, i)),
        compiler_params=pltpu.CompilerParams(
            dimension_semantics=("parallel",),
        ),
    )(x_t, w1b, b1f, w2b, b2f, w3b, b3f)

    return jnp.transpose(out_t)                          # [B, A]


def init_actor_params(key, state_size, action_size, fc1_units=24, fc2_units=48):
    """Deterministic init mirroring Actor.reset_parameters().

    hidden_init uses fan = weight.size()[0] (== out_features in PyTorch),
    so lim = 1/sqrt(out_features) for fc1/fc2; fc3 uses (-3e-3, 3e-3).
    Weights are stored [out, in] (PyTorch layout); biases [out, 1].
    """
    k1, k2, k3, kb1, kb2, kb3 = jax.random.split(key, 6)
    lim1 = 1.0 / jnp.sqrt(jnp.float32(fc1_units))
    lim2 = 1.0 / jnp.sqrt(jnp.float32(fc2_units))
    lim3 = 3e-3
    w1 = jax.random.uniform(k1, (fc1_units, state_size), jnp.float32, -lim1, lim1)
    w2 = jax.random.uniform(k2, (fc2_units, fc1_units), jnp.float32, -lim2, lim2)
    w3 = jax.random.uniform(k3, (action_size, fc2_units), jnp.float32, -lim3, lim3)
    # PyTorch Linear default bias init: uniform(-1/sqrt(in_features), +...)
    bl1 = 1.0 / jnp.sqrt(jnp.float32(state_size))
    bl2 = 1.0 / jnp.sqrt(jnp.float32(fc1_units))
    bl3 = 1.0 / jnp.sqrt(jnp.float32(fc2_units))
    b1 = jax.random.uniform(kb1, (fc1_units, 1), jnp.float32, -bl1, bl1)
    b2 = jax.random.uniform(kb2, (fc2_units, 1), jnp.float32, -bl2, bl2)
    b3 = jax.random.uniform(kb3, (action_size, 1), jnp.float32, -bl3, bl3)
    return w1, b1, w2, b2, w3, b3


def _reference(x, w1, b1, w2, b2, w3, b3):
    """Pure-JAX reference with the same bf16-operand / f32-accumulate math."""
    xt = jnp.transpose(x).astype(jnp.bfloat16)
    h1 = jnp.maximum(
        jnp.dot(w1.astype(jnp.bfloat16), xt, preferred_element_type=jnp.float32) + b1,
        0.0)
    h2 = jnp.maximum(
        jnp.dot(w2.astype(jnp.bfloat16), h1.astype(jnp.bfloat16),
                preferred_element_type=jnp.float32) + b2,
        0.0)
    h3 = jnp.dot(w3.astype(jnp.bfloat16), h2.astype(jnp.bfloat16),
                 preferred_element_type=jnp.float32) + b3
    return jnp.transpose(jnp.tanh(h3))


if __name__ == "__main__":
    key = jax.random.PRNGKey(0)
    k_params, k_x_small, k_x_big = jax.random.split(key, 3)

    state_size = 8
    action_size = 4
    params = init_actor_params(k_params, state_size, action_size)

    # Small case (single full-batch block).
    batch = 2
    x_small = jax.random.normal(k_x_small, (batch, state_size), jnp.float32)
    out_small = actor_forward(x_small, *params)
    jax.block_until_ready(out_small)
    assert out_small.shape == (batch, action_size)
    assert jnp.allclose(out_small, _reference(x_small, *params), atol=1e-4), \
        "small-batch mismatch vs reference"

    # Larger batch exercising the pipelined batch grid (>= 2 steps, ragged tail).
    big_batch = 1000
    x_big = jax.random.normal(k_x_big, (big_batch, state_size), jnp.float32)
    out_big = actor_forward(x_big, *params, batch_tile=512)
    jax.block_until_ready(out_big)
    assert out_big.shape == (big_batch, action_size)
    assert jnp.allclose(out_big, _reference(x_big, *params), atol=1e-4), \
        "tiled-batch mismatch vs reference"

    print("KERNEL_OK")
</pallas_src>

<mosaic_0001>
module attributes {stable_mosaic.version = 11 : i64} {
  func.func @actor_kernel(%arg0: i32, %arg1: memref<8x2xbf16, #tpu.memory_space<vmem>>, %arg2: memref<24x8xbf16, #tpu.memory_space<vmem>>, %arg3: memref<24x1xf32, #tpu.memory_space<vmem>>, %arg4: memref<48x24xbf16, #tpu.memory_space<vmem>>, %arg5: memref<48x1xf32, #tpu.memory_space<vmem>>, %arg6: memref<4x48xbf16, #tpu.memory_space<vmem>>, %arg7: memref<4x1xf32, #tpu.memory_space<vmem>>, %arg8: memref<4x2xf32, #tpu.memory_space<vmem>>) attributes {dimension_semantics = [#tpu.dimension_semantics<parallel>], iteration_bounds = array<i64: 1>, scalar_prefetch = 0 : i64, scratch_operands = 0 : i64, tpu.core_type = #tpu.core_type<tc>, window_params = [{transform_indices = @transform_0, window_bounds = array<i64: 8, 2>}, {pipeline_mode = #tpu.pipeline_mode<synchronous>, transform_indices = @transform_1, window_bounds = array<i64: 24, 8>}, {pipeline_mode = #tpu.pipeline_mode<synchronous>, transform_indices = @transform_2, window_bounds = array<i64: 24, 1>}, {pipeline_mode = #tpu.pipeline_mode<synchronous>, transform_indices = @transform_3, window_bounds = array<i64: 48, 24>}, {pipeline_mode = #tpu.pipeline_mode<synchronous>, transform_indices = @transform_4, window_bounds = array<i64: 48, 1>}, {pipeline_mode = #tpu.pipeline_mode<synchronous>, transform_indices = @transform_5, window_bounds = array<i64: 4, 48>}, {pipeline_mode = #tpu.pipeline_mode<synchronous>, transform_indices = @transform_6, window_bounds = array<i64: 4, 1>}, {transform_indices = @transform_7, window_bounds = array<i64: 4, 2>}]} {
    %c0 = arith.constant 0 : index
    %c0_0 = arith.constant 0 : index
    %0 = vector.load %arg1[%c0, %c0_0] : memref<8x2xbf16, #tpu.memory_space<vmem>>, vector<8x2xbf16>
    %c0_1 = arith.constant 0 : index
    %c0_2 = arith.constant 0 : index
    %1 = vector.load %arg2[%c0_1, %c0_2] : memref<24x8xbf16, #tpu.memory_space<vmem>>, vector<24x8xbf16>
    %cst = arith.constant dense<0.000000e+00> : vector<24x2xf32>
    %2 = tpu.matmul %1, %0, %cst {dimension_numbers = #tpu.dot_dimension_numbers<[1], [0], [0], [1], [0, 0, 1, 1], [], []>} : vector<24x8xbf16>, vector<8x2xbf16>, vector<24x2xf32> -> vector<24x2xf32>
    %c0_3 = arith.constant 0 : index
    %c0_4 = arith.constant 0 : index
    %3 = vector.load %arg3[%c0_3, %c0_4] : memref<24x1xf32, #tpu.memory_space<vmem>>, vector<24x1xf32>
    %4 = vector.broadcast %3 : vector<24x1xf32> to vector<24x2xf32>
    %5 = arith.addf %2, %4 : vector<24x2xf32>
    %cst_5 = arith.constant 0.000000e+00 : f32
    %6 = vector.broadcast %cst_5 : f32 to vector<24x2xf32>
    %7 = arith.maximumf %5, %6 : vector<24x2xf32>
    %c0_6 = arith.constant 0 : index
    %c0_7 = arith.constant 0 : index
    %8 = vector.load %arg4[%c0_6, %c0_7] : memref<48x24xbf16, #tpu.memory_space<vmem>>, vector<48x24xbf16>
    %9 = arith.truncf %7 : vector<24x2xf32> to vector<24x2xbf16>
    %cst_8 = arith.constant dense<0.000000e+00> : vector<48x2xf32>
    %10 = tpu.matmul %8, %9, %cst_8 {dimension_numbers = #tpu.dot_dimension_numbers<[1], [0], [0], [1], [0, 0, 1, 1], [], []>} : vector<48x24xbf16>, vector<24x2xbf16>, vector<48x2xf32> -> vector<48x2xf32>
    %c0_9 = arith.constant 0 : index
    %c0_10 = arith.constant 0 : index
    %11 = vector.load %arg5[%c0_9, %c0_10] : memref<48x1xf32, #tpu.memory_space<vmem>>, vector<48x1xf32>
    %12 = vector.broadcast %11 : vector<48x1xf32> to vector<48x2xf32>
    %13 = arith.addf %10, %12 : vector<48x2xf32>
    %cst_11 = arith.constant 0.000000e+00 : f32
    %14 = vector.broadcast %cst_11 : f32 to vector<48x2xf32>
    %15 = arith.maximumf %13, %14 : vector<48x2xf32>
    %c0_12 = arith.constant 0 : index
    %c0_13 = arith.constant 0 : index
    %16 = vector.load %arg6[%c0_12, %c0_13] : memref<4x48xbf16, #tpu.memory_space<vmem>>, vector<4x48xbf16>
    %17 = arith.truncf %15 : vector<48x2xf32> to vector<48x2xbf16>
    %cst_14 = arith.constant dense<0.000000e+00> : vector<4x2xf32>
    %18 = tpu.matmul %16, %17, %cst_14 {dimension_numbers = #tpu.dot_dimension_numbers<[1], [0], [0], [1], [0, 0, 1, 1], [], []>} : vector<4x48xbf16>, vector<48x2xbf16>, vector<4x2xf32> -> vector<4x2xf32>
    %c0_15 = arith.constant 0 : index
    %c0_16 = arith.constant 0 : index
    %19 = vector.load %arg7[%c0_15, %c0_16] : memref<4x1xf32, #tpu.memory_space<vmem>>, vector<4x1xf32>
    %20 = vector.broadcast %19 : vector<4x1xf32> to vector<4x2xf32>
    %21 = arith.addf %18, %20 : vector<4x2xf32>
    %22 = math.tanh %21 : vector<4x2xf32>
    %c0_17 = arith.constant 0 : index
    %c0_18 = arith.constant 0 : index
    %23 = vector.load %arg8[%c0_17, %c0_18] : memref<4x2xf32, #tpu.memory_space<vmem>>, vector<4x2xf32>
    tpu.vector_store %arg8[%c0_17, %c0_18], %22 {strides = array<i32>} : memref<4x2xf32, #tpu.memory_space<vmem>>, vector<4x2xf32>,
    return
  }
  func.func @transform_0(%arg0: i32) -> (i32, i32) {
    %c0_i32 = arith.constant 0 : i32
    %c0_i32_0 = arith.constant 0 : i32
    return %c0_i32, %arg0 : i32, i32
  }
  func.func @transform_1(%arg0: i32) -> (i32, i32) {
    %c0_i32 = arith.constant 0 : i32
    %c0_i32_0 = arith.constant 0 : i32
    %c0_i32_1 = arith.constant 0 : i32
    return %c0_i32, %c0_i32_0 : i32, i32
  }
  func.func @transform_2(%arg0: i32) -> (i32, i32) {
    %c0_i32 = arith.constant 0 : i32
    %c0_i32_0 = arith.constant 0 : i32
    %c0_i32_1 = arith.constant 0 : i32
    return %c0_i32, %c0_i32_0 : i32, i32
  }
  func.func @transform_3(%arg0: i32) -> (i32, i32) {
    %c0_i32 = arith.constant 0 : i32
    %c0_i32_0 = arith.constant 0 : i32
    %c0_i32_1 = arith.constant 0 : i32
    return %c0_i32, %c0_i32_0 : i32, i32
  }
  func.func @transform_4(%arg0: i32) -> (i32, i32) {
    %c0_i32 = arith.constant 0 : i32
    %c0_i32_0 = arith.constant 0 : i32
    %c0_i32_1 = arith.constant 0 : i32
    return %c0_i32, %c0_i32_0 : i32, i32
  }
  func.func @transform_5(%arg0: i32) -> (i32, i32) {
    %c0_i32 = arith.constant 0 : i32
    %c0_i32_0 = arith.constant 0 : i32
    %c0_i32_1 = arith.constant 0 : i32
    return %c0_i32, %c0_i32_0 : i32, i32
  }
  func.func @transform_6(%arg0: i32) -> (i32, i32) {
    %c0_i32 = arith.constant 0 : i32
    %c0_i32_0 = arith.constant 0 : i32
    %c0_i32_1 = arith.constant 0 : i32
    return %c0_i32, %c0_i32_0 : i32, i32
  }
  func.func @transform_7(%arg0: i32) -> (i32, i32) {
    %c0_i32 = arith.constant 0 : i32
    %c0_i32_0 = arith.constant 0 : i32
    return %c0_i32, %arg0 : i32, i32
  }
}

</mosaic_0001>

<bundles_post_ra>
// kernel: actor_forward.1
= control target key start
LH: loop header
LB: loop body
LE: loop exit
PB: predicated region body
PF: predicated region fallthrough
CT: control target
= control target key end

     0   :  { %vm64_vm0 = vcmask 1043456   ;;  %v259_v1 = vmov 0   ;;  %vm57_vm1 = vcmask 64512   ;;  %vm148_vm2 = vcmask 195584   ;;  %s358_s0 = inlined_call_operand.vmem [shape: bf16[8,2], index: 0, kind: input, shape index: {}]   ;;  %s359_s2 = inlined_call_operand.vmem [shape: f32[24,1], index: 2, kind: input, shape index: {}]   ;;  %s360_s1 = inlined_call_operand.vmem [shape: bf16[24,8], index: 1, kind: input, shape index: {}]   ;;  %s361_s4 = inlined_call_operand.vmem [shape: f32[48,1], index: 4, kind: input, shape index: {}]   ;;  %s362_s6 = inlined_call_operand.vmem [shape: f32[4,1], index: 6, kind: input, shape index: {}]   ;;  %s363_s3 = inlined_call_operand.vmem [shape: bf16[48,24], index: 3, kind: input, shape index: {}]   ;;  %s364_s5 = inlined_call_operand.vmem [shape: bf16[4,48], index: 5, kind: input, shape index: {}]   ;;  %s365_s7 = inlined_call_operand.vmem [shape: f32[4,2], index: 7, kind: output, shape index: {}]  }
   0x1   :  { %v27_v0 = vld [vmem:[%s358_s0] sm:$0xf]  ;;  %254 = vset.pattern.permute.xlu0 %v259_v1  ;;  %v33_v2 = vld [vmem:[%s359_s2 + $0x10] sm:$0xff]  ;;  %255 = vset.pattern.permute.xlu1 %v259_v1  ;;  %v32_v5 = vld [vmem:[%s359_s2 + $0x8] sm:$0xff]  ;;  %vm201_vm3 = vcmask 392192   ;;  %vm219_vm4 = vcmask 11264  }
   0x2   :  { %v66_v3 = vsel %vm64_vm0, %v27_v0, 0  ;;  %46 = vperm.xlu0 %254, %v33_v2   ;;  %v247_v4 = vld [vmem:[%s360_s1] sm:$0xff]  ;;  %256 = vset.pattern.permute.xlu2 %v259_v1  ;;  %v30_v8 = vld [vmem:[%s360_s1 + $0x8] sm:$0xf]  ;;  %v100_v10 = vld [vmem:[%s361_s4 + $0x18] sm:$0xff] }
   0x3   :  { %75 = vmatpush.bf16.msra.mxu0 %v66_v3  ;;  %41 = vperm.xlu1 %255, %v32_v5   ;;  %v31_v6 = vld [vmem:[%s359_s2] sm:$0xff]  ;;  %v54_v9 = vunpack.c.l.b16 %v30_v8  ;;  %v102_v17 = vld [vmem:[%s361_s4 + $0x28] sm:$0xff]  ;;  %v99_v27 = vld [vmem:[%s361_s4 + $0x10] sm:$0xff] }
   0x4   :  { %v101_v7 = vld [vmem:[%s361_s4 + $0x20] sm:$0xff]  ;;  %130 = vperm.xlu2 %256, %v102_v17   ;;  %v249_v33 = vld [vmem:[%s363_s3 + $0x8] sm:$0xff]  ;;  %v250_v35 = vld [vmem:[%s363_s3 + $0x10] sm:$0xff] }
   0x5   :  { %v97_v11 = vld [vmem:[%s361_s4] sm:$0xff]  ;;  %v56_v12 = vpack.c.b16 %v54_v9, %v54_v9  ;;  %v98_v34 = vld [vmem:[%s361_s4 + $0x8] sm:$0xff] }
   0x6   :  { %229 = vmatmul.msk.bf16.vlgmr.msra.gmra.mxu0 %vm57_vm1, %v247_v4  ;;  %v195_v13 = vld [vmem:[%s362_s6] sm:$0xf] }
   0x7   :  { %v248_v32 = vld [vmem:[%s363_s3] sm:$0xff] }
   0x8   :  { %v191_v63 = vld [vmem:[%s364_s5] sm:$0x3] }
   0xa   :  { %36 = vperm.xlu0 %254, %v31_v6  }
   0xb   :  { %125 = vperm.xlu1 %255, %v101_v7  }
   0xc   :  { %115 = vperm.xlu2 %256, %v99_v27  }
  0x12   :  { %120 = vperm.xlu0 %254, %v100_v10  }
  0x13   :  { %105 = vperm.xlu1 %255, %v97_v11  }
  0x14   :  { %110 = vperm.xlu2 %256, %v98_v34  }
  0x16   :  { %230 = vmatmul.msk.bf16.gmra.mxu0 %vm57_vm1, %v56_v12 }
  0x1a   :  { %198 = vperm.xlu0 %254, %v195_v13  }
  0x5e   :  { %v131_v37 = vpop.permute.xlu2 %130 }
  0x66   :  { %v116_v39 = vpop.permute.xlu2 %115 }
  0x6e   :  { %v111_v48 = vpop.permute.xlu2 %110 }
  0x74   :  { %v47_v16 = vpop.permute.xlu0 %46 }
  0x75   :  { %v42_v19 = vpop.permute.xlu1 %41 }
  0x7c   :  { %v37_v22 = vpop.permute.xlu0 %36 }
  0x7d   :  { %v126_v42 = vpop.permute.xlu1 %125 }
  0x83   :  { %v77_v14 = vpop.f32.mrf.mxu0 }
  0x84   :  { %v78_v24 = vadd.f32 %v77_v14, %v37_v22  ;;  %v121_v44 = vpop.permute.xlu0 %120 }
  0x85   :  { %v106_v56 = vpop.permute.xlu1 %105 }
  0x86   :  { %v86_v29 = vmax.f32 %v78_v24, 0.0 }
  0x8b   :  { %v79_v15 = vpop.f32.mrf.mxu0 }
  0x8c   :  { %v80_v21 = vadd.f32 %v79_v15, %v42_v19  ;;  %v199_v0 = vpop.permute.xlu0 %198 }
  0x8e   :  { %v87_v26 = vmax.f32 %v80_v21, 0.0 }
  0x90   :  { %v95_v31 = vpack.c.bf16 %v87_v26, %v86_v29 }
  0x93   :  { %v82_v18 = vpop.f32.mrf.mxu0 }
  0x94   :  { %v83_v20 = vadd.f32 %v82_v18, %v47_v16 }
  0x96   :  { %v88_v23 = vmax.f32 %v83_v20, 0.0 }
  0x98   :  { %v96_v25 = vpack.c.bf16 %v88_v23, %v88_v23 }
  0x9a   :  { %v159_v28 = vsel %vm64_vm0, %v96_v25, 0 }
  0x9b   :  { %v84_v30 = vpop.f32.mrf.mxu0  ;;  %167 = vmatpush.bf16.msra.mxu1 %v159_v28  ;;  %251 = vmatpush.bf16.msra.mxu3 %v159_v28 }
  0x9f   :  { %168 = vmatpush.bf16.msra.mxu1 %v95_v31  ;;  %252 = vmatpush.bf16.msra.mxu3 %v95_v31 }
  0xa2   :  { %243 = vmatmul.msk.bf16.vlgmr.msra.gmra.mxu1 %vm148_vm2, %v248_v32  ;;  %244 = vmatmul.msk.bf16.vlgmr.msra.gmra.mxu3 %vm148_vm2, %v249_v33 }
  0xb2   :  { %245 = vmatmul.msk.bf16.gmra.mxu3 %vm148_vm2, %v250_v35 }
 0x11f   :  { %v170_v40 = vpop.f32.mrf.mxu1 }
 0x120   :  { %v171_v57 = vadd.f32 %v170_v40, %v106_v56 }
 0x122   :  { %v185_v61 = vmax.f32 %v171_v57, 0.0 }
 0x125   :  { %v175_v36 = vpop.f32.mrf.mxu3 }
 0x126   :  { %v176_v50 = vadd.f32 %v175_v36, %v116_v39 }
 0x127   :  { %v172_v49 = vpop.f32.mrf.mxu1 }
 0x128   :  { %v173_v53 = vadd.f32 %v172_v49, %v111_v48  ;;  %v187_v58 = vmax.f32 %v176_v50, 0.0 }
 0x12a   :  { %v186_v59 = vmax.f32 %v173_v53, 0.0 }
 0x12c   :  { %v192_v62 = vpack.c.bf16 %v186_v59, %v185_v61 }
 0x12d   :  { %v177_v38 = vpop.f32.mrf.mxu3 }
 0x12e   :  { %v178_v46 = vadd.f32 %v177_v38, %v121_v44 }
 0x130   :  { %v188_v54 = vmax.f32 %v178_v46, 0.0 }
 0x132   :  { %v193_v60 = vpack.c.bf16 %v188_v54, %v187_v58 }
 0x135   :  { %v180_v41 = vpop.f32.mrf.mxu3 }
 0x136   :  { %v181_v43 = vadd.f32 %v180_v41, %v126_v42 }
 0x138   :  { %v189_v51 = vmax.f32 %v181_v43, 0.0 }
 0x13d   :  { %v182_v45 = vpop.f32.mrf.mxu3 }
 0x13e   :  { %v183_v47 = vadd.f32 %v182_v45, %v131_v37 }
 0x140   :  { %v190_v52 = vmax.f32 %v183_v47, 0.0 }
 0x142   :  { %v194_v55 = vpack.c.bf16 %v190_v52, %v189_v51 }
 0x144   :  { %210 = vmatpush.bf16.msra.mxu2 %v194_v55 }
 0x148   :  { %211 = vmatpush.bf16.msra.mxu2 %v193_v60 }
 0x14c   :  { %212 = vmatpush.bf16.msra.mxu2 %v192_v62 }
 0x14f   :  { %246 = vmatmul.msk.bf16.vlgmr.msra.gmra.mxu2 %vm201_vm3, %v191_v63 }
 0x1d2   :  { %v214_v1 = vpop.f32.mrf.mxu2 }
 0x1d3   :  { %v215_v2 = vadd.f32 %v214_v1, %v199_v0 }
 0x1d5   :  { %257 = vtanh.f32 %v215_v2 }
 0x1da   :  { %v216_v3 = vpop.f32.mrf.mxu2 }
 0x1db   :  { %v258_v4 = vpop.eup %257 }
 0x1dc   :  { %220 = vst.msk [vmem:[%s365_s7] sm:$0xf] %vm219_vm4, %v258_v4 }

</bundles_post_ra>
